<compile_context>
chip_gen: v7x
topology: tpu7x:2x2x1
jax: 0.10.0
libtpu: 0.0.40
codegen_flags: <defaults>
</compile_context>

<pallas_src>
import functools

import jax
import jax.numpy as jnp
import numpy as np
from jax.experimental import pallas as pl
from jax.experimental.pallas import tpu as pltpu

_EPS = 1e-5
_VMEM_LIMIT = 32 * 1024 * 1024  # scoped-VMEM cap safe on v5e / v6e / v7x


def _round_up(x, m):
    return (x + m - 1) // m * m


def _pick_tm(m):
    # Biggest M tile worth using; small problems use a single 8-aligned tile.
    return 512 if m >= 512 else _round_up(m, 8)


# ----------------------------------------------------------------------------
# Kernel 1: tiled conv-as-matmul + per-tile BN partial statistics
# ----------------------------------------------------------------------------
def _conv_stats_kernel(x_ref, w_ref, y_ref, stats_ref):
    # MXU matmul (bf16 or f32 inputs, f32 accumulation)
    y = jnp.dot(x_ref[...], w_ref[...], preferred_element_type=jnp.float32)
    y_ref[...] = y
    # Single-pass partial stats for this M tile (zero-padded rows contribute 0).
    s = jnp.sum(y, axis=0, keepdims=True)        # (1, C)
    sq = jnp.sum(y * y, axis=0, keepdims=True)   # (1, C)
    stats_ref[...] = jnp.concatenate([s, sq], axis=0)[None]   # (1, 2, C)


def _conv_matmul_stats(patches, w, *, tm):
    """patches: [M, K], w: [K, Cp].  Returns (y_raw [M_pad, Cp] f32, sum, sumsq)."""
    m, k = patches.shape
    cout = w.shape[1]
    m_pad = _round_up(m, tm)
    if m_pad != m:
        patches = jnp.pad(patches, ((0, m_pad - m), (0, 0)))
    grid = m_pad // tm

    flops = int(2 * m_pad * k * cout)
    bytes_acc = int(patches.size * patches.dtype.itemsize
                    + w.size * w.dtype.itemsize
                    + m_pad * cout * 4
                    + grid * 2 * cout * 4)

    y, stats = pl.pallas_call(
        _conv_stats_kernel,
        out_shape=(jax.ShapeDtypeStruct((m_pad, cout), jnp.float32),
                   jax.ShapeDtypeStruct((grid, 2, cout), jnp.float32)),
        grid=(grid,),
        in_specs=[pl.BlockSpec((tm, k), lambda i: (i, 0)),
                  pl.BlockSpec((k, cout), lambda i: (0, 0))],     # weight resident
        out_specs=(pl.BlockSpec((tm, cout), lambda i: (i, 0)),
                   pl.BlockSpec((1, 2, cout), lambda i: (i, 0, 0))),
        compiler_params=pltpu.CompilerParams(
            dimension_semantics=("parallel",),
            vmem_limit_bytes=_VMEM_LIMIT),
        cost_estimate=pl.CostEstimate(flops=flops, transcendentals=0,
                                      bytes_accessed=bytes_acc),
    )(patches, w)

    sums = jnp.sum(stats, axis=0)    # (2, Cp) global reduce of per-tile partials
    return y, sums[0], sums[1]


# ----------------------------------------------------------------------------
# Kernel 2: fused  bn2(y2) + shortcut-BN(residual) + add + ReLU
# ----------------------------------------------------------------------------
def _finalize_kernel(y_ref, r_ref, s2_ref, b2_ref, sr_ref, br_ref, o_ref):
    out = y_ref[...] * s2_ref[...] + b2_ref[...]
    out = out + r_ref[...].astype(jnp.float32) * sr_ref[...] + br_ref[...]
    o_ref[...] = jnp.maximum(out, 0.0).astype(o_ref.dtype)


def _finalize(y2, residual, scale2, shift2, r_scale, r_shift, *, tm):
    m_pad, c = y2.shape
    grid = m_pad // tm
    tile = pl.BlockSpec((tm, c), lambda i: (i, 0))
    vec = pl.BlockSpec((1, c), lambda i: (0, 0))
    flops = int(6 * m_pad * c)
    bytes_acc = int((y2.size + residual.size + m_pad * c) * 4 + 4 * c * 4)
    return pl.pallas_call(
        _finalize_kernel,
        out_shape=jax.ShapeDtypeStruct((m_pad, c), jnp.float32),
        grid=(grid,),
        in_specs=[tile, tile, vec, vec, vec, vec],
        out_specs=tile,
        compiler_params=pltpu.CompilerParams(
            dimension_semantics=("parallel",),
            vmem_limit_bytes=_VMEM_LIMIT),
        cost_estimate=pl.CostEstimate(flops=flops, transcendentals=0,
                                      bytes_accessed=bytes_acc),
    )(y2, residual, scale2, shift2, r_scale, r_shift)


# ----------------------------------------------------------------------------
# JAX glue: im2col, weight packing, BN scale/shift finalization
# ----------------------------------------------------------------------------
def _im2col1d(x_nlc, kernel_size, stride, pad, c_pad, dtype):
    """x_nlc: [N, L, C] -> patches [N*L_out, kernel_size*c_pad], L_out."""
    n, l, c = x_nlc.shape
    xp = jnp.pad(x_nlc, ((0, 0), (pad, pad), (0, c_pad - c)))
    l_out = (l + 2 * pad - kernel_size) // stride + 1
    starts = jnp.arange(l_out) * stride
    patches = jnp.stack([xp[:, starts + k, :] for k in range(kernel_size)], axis=2)
    return patches.reshape(n * l_out, kernel_size * c_pad).astype(dtype), l_out


def _weight_to_matrix(w, cin_pad, cout_pad, dtype):
    """PyTorch conv1d weight [Cout, Cin, K] -> padded matmul weight [K*cin_pad, cout_pad]."""
    cout, cin, k = w.shape
    wm = jnp.transpose(w, (2, 1, 0))                               # [K, Cin, Cout]
    wm = jnp.pad(wm, ((0, 0), (0, cin_pad - cin), (0, cout_pad - cout)))
    return wm.reshape(k * cin_pad, cout_pad).astype(dtype)


def _bn_scale_shift(s, sq, count, gamma, beta, c_pad):
    """Global batch stats (biased var, single pass) -> per-channel scale/shift."""
    mu = s / count
    var = jnp.maximum(sq / count - mu * mu, 0.0)
    g = jnp.pad(gamma, (0, c_pad - gamma.shape[0]), constant_values=1.0)
    b = jnp.pad(beta, (0, c_pad - beta.shape[0]))
    scale = g * jax.lax.rsqrt(var + _EPS)
    shift = b - mu * scale
    return scale.reshape(1, c_pad).astype(jnp.float32), shift.reshape(1, c_pad).astype(jnp.float32)


# ----------------------------------------------------------------------------
# BasicBlock forward
# ----------------------------------------------------------------------------
@functools.partial(jax.jit, static_argnames=("stride", "compute_dtype"))
def basic_block_forward(x_ncl, params, stride, compute_dtype=jnp.bfloat16):
    """x_ncl: [N, C_in, L] float32 (PyTorch NCL).  Returns [N, planes, L_out]."""
    n, cin, _ = x_ncl.shape
    planes = params["w1"].shape[0]
    x_nlc = jnp.transpose(x_ncl, (0, 2, 1))                        # [N, L, Cin]

    cin8 = _round_up(cin, 8)        # sublane-aligned input channels
    cp8 = _round_up(planes, 8)      # sublane-aligned intermediate channels
    c128 = _round_up(planes, 128)   # lane-dense output channels

    # ---- conv1 (k=3, stride, pad=1): tiled matmul + BN stats ----
    p1, l_out = _im2col1d(x_nlc, 3, stride, 1, cin8, compute_dtype)
    w1 = _weight_to_matrix(params["w1"], cin8, c128, compute_dtype)
    m = n * l_out
    tm = _pick_tm(m)
    y1, s1, sq1 = _conv_matmul_stats(p1, w1, tm=tm)
    scale1, shift1 = _bn_scale_shift(s1, sq1, m, params["gamma1"], params["beta1"], c128)

    # bn1 + relu: per-element affine+relu, fused by XLA into the conv2 im2col gather
    out1 = jnp.maximum(y1[:m, :cp8] * scale1[:, :cp8] + shift1[:, :cp8], 0.0)
    out1_nlc = out1.reshape(n, l_out, cp8)

    # ---- conv2 (k=3, stride=1, pad=1): tiled matmul + BN stats ----
    p2, _ = _im2col1d(out1_nlc, 3, 1, 1, cp8, compute_dtype)
    w2 = _weight_to_matrix(params["w2"], cp8, c128, compute_dtype)
    y2, s2, sq2 = _conv_matmul_stats(p2, w2, tm=tm)
    scale2, shift2 = _bn_scale_shift(s2, sq2, m, params["gamma2"], params["beta2"], c128)

    m_pad = _round_up(m, tm)

    # ---- shortcut ----
    if "w_sc" in params:
        # 1x1 strided conv = channel matmul on strided rows; its BN is fused into
        # the finalize kernel, so only the RAW conv output hits HBM.
        x_str = x_nlc[:, ::stride, :][:, :l_out, :]
        x_str = jnp.pad(x_str, ((0, 0), (0, 0), (0, cin8 - cin)))
        x_str = x_str.reshape(m, cin8).astype(compute_dtype)
        w_sc = _weight_to_matrix(params["w_sc"], cin8, c128, compute_dtype)
        residual, ssc, sqsc = _conv_matmul_stats(x_str, w_sc, tm=tm)
        r_scale, r_shift = _bn_scale_shift(ssc, sqsc, m,
                                           params["gamma_sc"], params["beta_sc"], c128)
    else:
        # identity shortcut (stride==1, cin==planes): pass x through with unit affine
        residual = jnp.pad(x_nlc.reshape(m, cin), ((0, m_pad - m), (0, c128 - cin)))
        r_scale = jnp.ones((1, c128), jnp.float32)
        r_shift = jnp.zeros((1, c128), jnp.float32)

    # ---- fused bn2 + shortcut-BN + residual add + relu ----
    out = _finalize(y2, residual, scale2, shift2, r_scale, r_shift, tm=tm)
    out = out[:m, :planes].reshape(n, l_out, planes)
    return jnp.transpose(out, (0, 2, 1))                           # -> NCL


# ----------------------------------------------------------------------------
# Pure-JAX f32 reference (numerical cross-check)
# ----------------------------------------------------------------------------
def _ref_forward(x, params, stride):
    def conv1d(x, w, s, pad):
        return jax.lax.conv_general_dilated(
            x, w, (s,), [(pad, pad)], dimension_numbers=("NCH", "OIH", "NCH"))

    def bn(y, gamma, beta):
        mu = y.mean(axis=(0, 2), keepdims=True)
        var = ((y - mu) ** 2).mean(axis=(0, 2), keepdims=True)
        return (y - mu) * (gamma[None, :, None] / jnp.sqrt(var + _EPS)) + beta[None, :, None]

    out = jax.nn.relu(bn(conv1d(x, params["w1"], stride, 1), params["gamma1"], params["beta1"]))
    out = bn(conv1d(out, params["w2"], 1, 1), params["gamma2"], params["beta2"])
    if "w_sc" in params:
        sc = bn(conv1d(x, params["w_sc"], stride, 0), params["gamma_sc"], params["beta_sc"])
    else:
        sc = x
    return jax.nn.relu(out + sc)


# ----------------------------------------------------------------------------
# Deterministic parameter init + run
# ----------------------------------------------------------------------------
def make_params(key, in_planes, planes, stride):
    ks = jax.random.split(key, 8)
    params = {
        "w1": 0.1 * jax.random.normal(ks[0], (planes, in_planes, 3), jnp.float32),
        "gamma1": 1.0 + 0.1 * jax.random.normal(ks[1], (planes,), jnp.float32),
        "beta1": 0.1 * jax.random.normal(ks[2], (planes,), jnp.float32),
        "w2": 0.1 * jax.random.normal(ks[3], (planes, planes, 3), jnp.float32),
        "gamma2": 1.0 + 0.1 * jax.random.normal(ks[4], (planes,), jnp.float32),
        "beta2": 0.1 * jax.random.normal(ks[5], (planes,), jnp.float32),
    }
    if stride != 1 or in_planes != planes:
        params["w_sc"] = 0.1 * jax.random.normal(ks[6], (planes, in_planes, 1), jnp.float32)
        params["gamma_sc"] = jnp.ones((planes,), jnp.float32)
        params["beta_sc"] = jnp.zeros((planes,), jnp.float32)
    return params


if __name__ == "__main__":
    key = jax.random.PRNGKey(0)
    kx, kp = jax.random.split(key)

    N, IN_PLANES, PLANES, L, STRIDE = 2, 4, 8, 16, 2   # exercises the conv shortcut
    x = jax.random.normal(kx, (N, IN_PLANES, L), jnp.float32)
    params = make_params(kp, IN_PLANES, PLANES, STRIDE)
    ref = jax.block_until_ready(_ref_forward(x, params, STRIDE))

    # default bf16-MXU path (looser tolerance: bf16 matmul inputs + BN rsqrt)
    out = jax.block_until_ready(basic_block_forward(x, params, stride=STRIDE))
    np.testing.assert_allclose(np.asarray(out), np.asarray(ref), rtol=5e-2, atol=5e-2)

    # f32-compute path validates exact semantics at tight tolerance
    out32 = jax.block_until_ready(
        basic_block_forward(x, params, stride=STRIDE, compute_dtype=jnp.float32))
    np.testing.assert_allclose(np.asarray(out32), np.asarray(ref), rtol=1e-3, atol=1e-3)

    # identity-shortcut configuration (stride=1, in_planes==planes)
    params_id = make_params(kp, PLANES, PLANES, 1)
    x_id = jax.random.normal(kx, (N, PLANES, L), jnp.float32)
    ref_id = jax.block_until_ready(_ref_forward(x_id, params_id, 1))
    out_id = jax.block_until_ready(basic_block_forward(x_id, params_id, stride=1))
    np.testing.assert_allclose(np.asarray(out_id), np.asarray(ref_id), rtol=5e-2, atol=5e-2)
    out_id32 = jax.block_until_ready(
        basic_block_forward(x_id, params_id, stride=1, compute_dtype=jnp.float32))
    np.testing.assert_allclose(np.asarray(out_id32), np.asarray(ref_id), rtol=1e-3, atol=1e-3)

    print("KERNEL_OK")
</pallas_src>

<mosaic_0001>
module attributes {stable_mosaic.version = 11 : i64} {
  func.func @_conv_stats_kernel(%arg0: i32, %arg1: memref<16x24xbf16, #tpu.memory_space<vmem>>, %arg2: memref<24x128xbf16, #tpu.memory_space<vmem>>, %arg3: memref<16x128xf32, #tpu.memory_space<vmem>>, %arg4: memref<1x2x128xf32, #tpu.memory_space<vmem>>) attributes {dimension_semantics = [#tpu.dimension_semantics<parallel>], iteration_bounds = array<i64: 1>, scalar_prefetch = 0 : i64, scratch_operands = 0 : i64, tpu.core_type = #tpu.core_type<tc>, window_params = [{transform_indices = @transform_0, window_bounds = array<i64: 16, 24>}, {pipeline_mode = #tpu.pipeline_mode<synchronous>, transform_indices = @transform_1, window_bounds = array<i64: 24, 128>}, {transform_indices = @transform_2, window_bounds = array<i64: 16, 128>}, {transform_indices = @transform_3, window_bounds = array<i64: 1, 2, 128>}]} {
    %c0 = arith.constant 0 : index
    %c0_0 = arith.constant 0 : index
    %0 = vector.load %arg1[%c0, %c0_0] : memref<16x24xbf16, #tpu.memory_space<vmem>>, vector<16x24xbf16>
    %c0_1 = arith.constant 0 : index
    %c0_2 = arith.constant 0 : index
    %1 = vector.load %arg2[%c0_1, %c0_2] : memref<24x128xbf16, #tpu.memory_space<vmem>>, vector<24x128xbf16>
    %cst = arith.constant dense<0.000000e+00> : vector<16x128xf32>
    %2 = tpu.matmul %0, %1, %cst {dimension_numbers = #tpu.dot_dimension_numbers<[1], [0], [0], [1], [0, 0, 1, 1], [], []>} : vector<16x24xbf16>, vector<24x128xbf16>, vector<16x128xf32> -> vector<16x128xf32>
    %c0_3 = arith.constant 0 : index
    %c0_4 = arith.constant 0 : index
    %3 = vector.load %arg3[%c0_3, %c0_4] : memref<16x128xf32, #tpu.memory_space<vmem>>, vector<16x128xf32>
    tpu.vector_store %arg3[%c0_3, %c0_4], %2 {strides = array<i32>} : memref<16x128xf32, #tpu.memory_space<vmem>>, vector<16x128xf32>,
    %cst_5 = arith.constant dense<0.000000e+00> : vector<128xf32>
    %4 = vector.multi_reduction <add>, %2, %cst_5 [0] : vector<16x128xf32> to vector<128xf32>
    %5 = vector.shape_cast %4 : vector<128xf32> to vector<1x128xf32>
    %6 = arith.mulf %2, %2 : vector<16x128xf32>
    %cst_6 = arith.constant dense<0.000000e+00> : vector<128xf32>
    %7 = vector.multi_reduction <add>, %6, %cst_6 [0] : vector<16x128xf32> to vector<128xf32>
    %8 = vector.shape_cast %7 : vector<128xf32> to vector<1x128xf32>
    %9 = tpu.concatenate %5, %8 in 0 : vector<1x128xf32>, vector<1x128xf32> -> vector<2x128xf32>
    %10 = vector.shape_cast %9 : vector<2x128xf32> to vector<1x2x128xf32>
    %c0_7 = arith.constant 0 : index
    %c0_8 = arith.constant 0 : index
    %c0_9 = arith.constant 0 : index
    %11 = vector.load %arg4[%c0_7, %c0_8, %c0_9] : memref<1x2x128xf32, #tpu.memory_space<vmem>>, vector<1x2x128xf32>
    tpu.vector_store %arg4[%c0_7, %c0_8, %c0_9], %10 {strides = array<i32>} : memref<1x2x128xf32, #tpu.memory_space<vmem>>, vector<1x2x128xf32>,
    return
  }
  func.func @transform_0(%arg0: i32) -> (i32, i32) {
    %c0_i32 = arith.constant 0 : i32
    %c0_i32_0 = arith.constant 0 : i32
    return %arg0, %c0_i32 : i32, i32
  }
  func.func @transform_1(%arg0: i32) -> (i32, i32) {
    %c0_i32 = arith.constant 0 : i32
    %c0_i32_0 = arith.constant 0 : i32
    %c0_i32_1 = arith.constant 0 : i32
    return %c0_i32, %c0_i32_0 : i32, i32
  }
  func.func @transform_2(%arg0: i32) -> (i32, i32) {
    %c0_i32 = arith.constant 0 : i32
    %c0_i32_0 = arith.constant 0 : i32
    return %arg0, %c0_i32 : i32, i32
  }
  func.func @transform_3(%arg0: i32) -> (i32, i32, i32) {
    %c0_i32 = arith.constant 0 : i32
    %c0_i32_0 = arith.constant 0 : i32
    %c0_i32_1 = arith.constant 0 : i32
    return %arg0, %c0_i32, %c0_i32_0 : i32, i32, i32
  }
}

module attributes {stable_mosaic.version = 11 : i64} {
  func.func @_conv_stats_kernel(%arg0: i32, %arg1: memref<16x8xbf16, #tpu.memory_space<vmem>>, %arg2: memref<8x128xbf16, #tpu.memory_space<vmem>>, %arg3: memref<16x128xf32, #tpu.memory_space<vmem>>, %arg4: memref<1x2x128xf32, #tpu.memory_space<vmem>>) attributes {dimension_semantics = [#tpu.dimension_semantics<parallel>], iteration_bounds = array<i64: 1>, scalar_prefetch = 0 : i64, scratch_operands = 0 : i64, tpu.core_type = #tpu.core_type<tc>, window_params = [{transform_indices = @transform_0, window_bounds = array<i64: 16, 8>}, {pipeline_mode = #tpu.pipeline_mode<synchronous>, transform_indices = @transform_1, window_bounds = array<i64: 8, 128>}, {transform_indices = @transform_2, window_bounds = array<i64: 16, 128>}, {transform_indices = @transform_3, window_bounds = array<i64: 1, 2, 128>}]} {
    %c0 = arith.constant 0 : index
    %c0_0 = arith.constant 0 : index
    %0 = vector.load %arg1[%c0, %c0_0] : memref<16x8xbf16, #tpu.memory_space<vmem>>, vector<16x8xbf16>
    %c0_1 = arith.constant 0 : index
    %c0_2 = arith.constant 0 : index
    %1 = vector.load %arg2[%c0_1, %c0_2] : memref<8x128xbf16, #tpu.memory_space<vmem>>, vector<8x128xbf16>
    %cst = arith.constant dense<0.000000e+00> : vector<16x128xf32>
    %2 = tpu.matmul %0, %1, %cst {dimension_numbers = #tpu.dot_dimension_numbers<[1], [0], [0], [1], [0, 0, 1, 1], [], []>} : vector<16x8xbf16>, vector<8x128xbf16>, vector<16x128xf32> -> vector<16x128xf32>
    %c0_3 = arith.constant 0 : index
    %c0_4 = arith.constant 0 : index
    %3 = vector.load %arg3[%c0_3, %c0_4] : memref<16x128xf32, #tpu.memory_space<vmem>>, vector<16x128xf32>
    tpu.vector_store %arg3[%c0_3, %c0_4], %2 {strides = array<i32>} : memref<16x128xf32, #tpu.memory_space<vmem>>, vector<16x128xf32>,
    %cst_5 = arith.constant dense<0.000000e+00> : vector<128xf32>
    %4 = vector.multi_reduction <add>, %2, %cst_5 [0] : vector<16x128xf32> to vector<128xf32>
    %5 = vector.shape_cast %4 : vector<128xf32> to vector<1x128xf32>
    %6 = arith.mulf %2, %2 : vector<16x128xf32>
    %cst_6 = arith.constant dense<0.000000e+00> : vector<128xf32>
    %7 = vector.multi_reduction <add>, %6, %cst_6 [0] : vector<16x128xf32> to vector<128xf32>
    %8 = vector.shape_cast %7 : vector<128xf32> to vector<1x128xf32>
    %9 = tpu.concatenate %5, %8 in 0 : vector<1x128xf32>, vector<1x128xf32> -> vector<2x128xf32>
    %10 = vector.shape_cast %9 : vector<2x128xf32> to vector<1x2x128xf32>
    %c0_7 = arith.constant 0 : index
    %c0_8 = arith.constant 0 : index
    %c0_9 = arith.constant 0 : index
    %11 = vector.load %arg4[%c0_7, %c0_8, %c0_9] : memref<1x2x128xf32, #tpu.memory_space<vmem>>, vector<1x2x128xf32>
    tpu.vector_store %arg4[%c0_7, %c0_8, %c0_9], %10 {strides = array<i32>} : memref<1x2x128xf32, #tpu.memory_space<vmem>>, vector<1x2x128xf32>,
    return
  }
  func.func @transform_0(%arg0: i32) -> (i32, i32) {
    %c0_i32 = arith.constant 0 : i32
    %c0_i32_0 = arith.constant 0 : i32
    return %arg0, %c0_i32 : i32, i32
  }
  func.func @transform_1(%arg0: i32) -> (i32, i32) {
    %c0_i32 = arith.constant 0 : i32
    %c0_i32_0 = arith.constant 0 : i32
    %c0_i32_1 = arith.constant 0 : i32
    return %c0_i32, %c0_i32_0 : i32, i32
  }
  func.func @transform_2(%arg0: i32) -> (i32, i32) {
    %c0_i32 = arith.constant 0 : i32
    %c0_i32_0 = arith.constant 0 : i32
    return %arg0, %c0_i32 : i32, i32
  }
  func.func @transform_3(%arg0: i32) -> (i32, i32, i32) {
    %c0_i32 = arith.constant 0 : i32
    %c0_i32_0 = arith.constant 0 : i32
    %c0_i32_1 = arith.constant 0 : i32
    return %arg0, %c0_i32, %c0_i32_0 : i32, i32, i32
  }
}

module attributes {stable_mosaic.version = 11 : i64} {
  func.func @_finalize_kernel(%arg0: i32, %arg1: memref<16x128xf32, #tpu.memory_space<vmem>>, %arg2: memref<16x128xf32, #tpu.memory_space<vmem>>, %arg3: memref<1x128xf32, #tpu.memory_space<vmem>>, %arg4: memref<1x128xf32, #tpu.memory_space<vmem>>, %arg5: memref<1x128xf32, #tpu.memory_space<vmem>>, %arg6: memref<1x128xf32, #tpu.memory_space<vmem>>, %arg7: memref<16x128xf32, #tpu.memory_space<vmem>>) attributes {dimension_semantics = [#tpu.dimension_semantics<parallel>], iteration_bounds = array<i64: 1>, scalar_prefetch = 0 : i64, scratch_operands = 0 : i64, tpu.core_type = #tpu.core_type<tc>, window_params = [{transform_indices = @transform_0, window_bounds = array<i64: 16, 128>}, {transform_indices = @transform_1, window_bounds = array<i64: 16, 128>}, {pipeline_mode = #tpu.pipeline_mode<synchronous>, transform_indices = @transform_2, window_bounds = array<i64: 1, 128>}, {pipeline_mode = #tpu.pipeline_mode<synchronous>, transform_indices = @transform_3, window_bounds = array<i64: 1, 128>}, {pipeline_mode = #tpu.pipeline_mode<synchronous>, transform_indices = @transform_4, window_bounds = array<i64: 1, 128>}, {pipeline_mode = #tpu.pipeline_mode<synchronous>, transform_indices = @transform_5, window_bounds = array<i64: 1, 128>}, {transform_indices = @transform_6, window_bounds = array<i64: 16, 128>}]} {
    %c0 = arith.constant 0 : index
    %c0_0 = arith.constant 0 : index
    %0 = vector.load %arg1[%c0, %c0_0] : memref<16x128xf32, #tpu.memory_space<vmem>>, vector<16x128xf32>
    %c0_1 = arith.constant 0 : index
    %c0_2 = arith.constant 0 : index
    %1 = vector.load %arg3[%c0_1, %c0_2] : memref<1x128xf32, #tpu.memory_space<vmem>>, vector<1x128xf32>
    %2 = vector.broadcast %1 : vector<1x128xf32> to vector<16x128xf32>
    %3 = arith.mulf %0, %2 : vector<16x128xf32>
    %c0_3 = arith.constant 0 : index
    %c0_4 = arith.constant 0 : index
    %4 = vector.load %arg4[%c0_3, %c0_4] : memref<1x128xf32, #tpu.memory_space<vmem>>, vector<1x128xf32>
    %5 = vector.broadcast %4 : vector<1x128xf32> to vector<16x128xf32>
    %6 = arith.addf %3, %5 : vector<16x128xf32>
    %c0_5 = arith.constant 0 : index
    %c0_6 = arith.constant 0 : index
    %7 = vector.load %arg2[%c0_5, %c0_6] : memref<16x128xf32, #tpu.memory_space<vmem>>, vector<16x128xf32>
    %c0_7 = arith.constant 0 : index
    %c0_8 = arith.constant 0 : index
    %8 = vector.load %arg5[%c0_7, %c0_8] : memref<1x128xf32, #tpu.memory_space<vmem>>, vector<1x128xf32>
    %9 = vector.broadcast %8 : vector<1x128xf32> to vector<16x128xf32>
    %10 = arith.mulf %7, %9 : vector<16x128xf32>
    %11 = arith.addf %6, %10 : vector<16x128xf32>
    %c0_9 = arith.constant 0 : index
    %c0_10 = arith.constant 0 : index
    %12 = vector.load %arg6[%c0_9, %c0_10] : memref<1x128xf32, #tpu.memory_space<vmem>>, vector<1x128xf32>
    %13 = vector.broadcast %12 : vector<1x128xf32> to vector<16x128xf32>
    %14 = arith.addf %11, %13 : vector<16x128xf32>
    %cst = arith.constant 0.000000e+00 : f32
    %15 = vector.broadcast %cst : f32 to vector<16x128xf32>
    %16 = arith.maximumf %14, %15 : vector<16x128xf32>
    %c0_11 = arith.constant 0 : index
    %c0_12 = arith.constant 0 : index
    %17 = vector.load %arg7[%c0_11, %c0_12] : memref<16x128xf32, #tpu.memory_space<vmem>>, vector<16x128xf32>
    tpu.vector_store %arg7[%c0_11, %c0_12], %16 {strides = array<i32>} : memref<16x128xf32, #tpu.memory_space<vmem>>, vector<16x128xf32>,
    return
  }
  func.func @transform_0(%arg0: i32) -> (i32, i32) {
    %c0_i32 = arith.constant 0 : i32
    %c0_i32_0 = arith.constant 0 : i32
    return %arg0, %c0_i32 : i32, i32
  }
  func.func @transform_1(%arg0: i32) -> (i32, i32) {
    %c0_i32 = arith.constant 0 : i32
    %c0_i32_0 = arith.constant 0 : i32
    return %arg0, %c0_i32 : i32, i32
  }
  func.func @transform_2(%arg0: i32) -> (i32, i32) {
    %c0_i32 = arith.constant 0 : i32
    %c0_i32_0 = arith.constant 0 : i32
    %c0_i32_1 = arith.constant 0 : i32
    return %c0_i32, %c0_i32_0 : i32, i32
  }
  func.func @transform_3(%arg0: i32) -> (i32, i32) {
    %c0_i32 = arith.constant 0 : i32
    %c0_i32_0 = arith.constant 0 : i32
    %c0_i32_1 = arith.constant 0 : i32
    return %c0_i32, %c0_i32_0 : i32, i32
  }
  func.func @transform_4(%arg0: i32) -> (i32, i32) {
    %c0_i32 = arith.constant 0 : i32
    %c0_i32_0 = arith.constant 0 : i32
    %c0_i32_1 = arith.constant 0 : i32
    return %c0_i32, %c0_i32_0 : i32, i32
  }
  func.func @transform_5(%arg0: i32) -> (i32, i32) {
    %c0_i32 = arith.constant 0 : i32
    %c0_i32_0 = arith.constant 0 : i32
    %c0_i32_1 = arith.constant 0 : i32
    return %c0_i32, %c0_i32_0 : i32, i32
  }
  func.func @transform_6(%arg0: i32) -> (i32, i32) {
    %c0_i32 = arith.constant 0 : i32
    %c0_i32_0 = arith.constant 0 : i32
    return %arg0, %c0_i32 : i32, i32
  }
}

</mosaic_0001>

<bundles_post_ra>
// kernel: basic_block_forward.4
= control target key start
LH: loop header
LB: loop body
LE: loop exit
PB: predicated region body
PF: predicated region fallthrough
CT: control target
= control target key end

     0   :  { %v131_v0 = vmov 0.0   ;;  %vm37_vm0 = vcmask 1043456   ;;  %vm132_vm1 = vmmov 0   ;;  %vm33_vm2 = vcmask 195584   ;;  %s171_s1 = inlined_call_operand.vmem [shape: bf16[24,128], index: 1, kind: input, shape index: {}]   ;;  %s172_s0 = inlined_call_operand.vmem [shape: bf16[16,24], index: 0, kind: input, shape index: {}]   ;;  %s173_s2 = inlined_call_operand.vmem [shape: f32[16,128], index: 2, kind: output, shape index: {0}]   ;;  %s174_s3 = inlined_call_operand.vmem [shape: f32[1,2,128], index: 3, kind: output, shape index: {1}]  }
   0x1   :  { %118 = vmatprep.subr.bf16.mxu0 %v131_v0  ;;  %v128_v1 = vld [vmem:[%s171_s1] sm:$0xff]   ;;  %122 = vmatprep.mubr.msk.bf16.mxu0 %vm132_vm1, %v131_v0  ;;  %v129_v2 = vld [vmem:[%s171_s1 + $0x8] ss:$0 sps:$4 sm:$0xff]   ;;  %vm100_vm3 = vcmask 1040384  }
   0x2   :  { %119 = vmatpush3.bf16.msra.mxu0 %v128_v1  ;;  %v39_v3 = vsel %vm37_vm0, %v129_v2, 0  ;;  %v130_v4 = vld [vmem:[%s172_s0] sm:$0xff]  }
   0x3   :  { %120 = vmatprep.subr.bf16.mxu0 %v131_v0 }
   0x6   :  { %121 = vmatpush3.bf16.msra.mxu0 %v39_v3 }
   0x9   :  { %123 = vmatmul.mubr.msk.bf16.vlgmr.msra.gmra.mrb[0].mxu0 %vm33_vm2, %v130_v4 }
  0xdc   :  { %v75_v5 = vpop.f32.mrb[0].mxu0 }
  0xdd   :  { %82 = vst [vmem:[%s173_s2] sm:$0xff] %v75_v5  ;;  %v124_v6 = vpop.f32.mrb[1].mxu0  ;;  %v91_v8 = vmul.f32 %v75_v5, %v75_v5 }
  0xde   :  { %v78_v7 = vpop.f32.mrb[2].mxu0 }
  0xdf   :  { %83 = vst [vmem:[%s173_s2 + $0x8] sm:$0xff] %v78_v7  ;;  %v84_v9 = vadd.f32 %v78_v7, %v75_v5  ;;  %v92_v10 = vmul.f32 %v78_v7, %v78_v7  ;;  %v125_v11 = vpop.f32.mrb[3].mxu0 }
  0xe1   :  { %v85_v12 = vrot.slane %v84_v9, 4  ;;  %v93_v13 = vadd.f32 %v92_v10, %v91_v8 }
  0xe3   :  { %v86_v14 = vadd.f32 %v85_v12, %v84_v9  ;;  %v94_v15 = vrot.slane %v93_v13, 4 }
  0xe5   :  { %v87_v16 = vrot.slane %v86_v14, 2  ;;  %v95_v17 = vadd.f32 %v94_v15, %v93_v13 }
  0xe7   :  { %v88_v18 = vadd.f32 %v87_v16, %v86_v14  ;;  %v96_v19 = vrot.slane %v95_v17, 2 }
  0xe9   :  { %v89_v20 = vrot.slane %v88_v18, 1  ;;  %v97_v21 = vadd.f32 %v96_v19, %v95_v17 }
  0xeb   :  { %v98_v22 = vrot.slane %v97_v21, 1  ;;  %v90_v23 = vadd.f32 %v89_v20, %v88_v18 }
  0xed   :  { %v99_v24 = vadd.f32 %v98_v22, %v97_v21 }
  0xef   :  { %v101_v25 = vsel %vm100_vm3, %v90_v23, %v99_v24 }
  0xf0   :  { %102 = vst [vmem:[%s174_s3] sm:$0x3] %v101_v25 }

// kernel: basic_block_forward.6
= control target key start
LH: loop header
LB: loop body
LE: loop exit
PB: predicated region body
PF: predicated region fallthrough
CT: control target
= control target key end

     0   :  { %vm26_vm0 = vcmask 1043456   ;;  %v113_v0 = vmov 0.0   ;;  %vm114_vm1 = vmmov 0   ;;  %vm22_vm2 = vcmask 64512   ;;  %s150_s1 = inlined_call_operand.vmem [shape: bf16[8,128], index: 1, kind: input, shape index: {}]   ;;  %s151_s0 = inlined_call_operand.vmem [shape: bf16[16,8], index: 0, kind: input, shape index: {}]   ;;  %s152_s2 = inlined_call_operand.vmem [shape: f32[16,128], index: 2, kind: output, shape index: {0}]   ;;  %s153_s3 = inlined_call_operand.vmem [shape: f32[1,2,128], index: 3, kind: output, shape index: {1}]  }
   0x1   :  { %104 = vmatprep.subr.bf16.mxu0 %v113_v0  ;;  %v16_v1 = vld [vmem:[%s150_s1] sm:$0xf]  ;;  %106 = vmatprep.mubr.msk.bf16.mxu0 %vm114_vm1, %v113_v0  ;;  %vm89_vm3 = vcmask 1040384  }
   0x2   :  { %v28_v2 = vsel %vm26_vm0, %v16_v1, 0  ;;  %v112_v3 = vld [vmem:[%s151_s0] sm:$0xff]  }
   0x3   :  { %105 = vmatpush3.bf16.msra.mxu0 %v28_v2 }
   0x6   :  { %107 = vmatmul.mubr.msk.bf16.vlgmr.msra.gmra.mrb[0].mxu0 %vm22_vm2, %v112_v3 }
  0xd9   :  { %v64_v4 = vpop.f32.mrb[0].mxu0 }
  0xda   :  { %71 = vst [vmem:[%s152_s2] sm:$0xff] %v64_v4  ;;  %v108_v5 = vpop.f32.mrb[1].mxu0  ;;  %v80_v7 = vmul.f32 %v64_v4, %v64_v4 }
  0xdb   :  { %v67_v6 = vpop.f32.mrb[2].mxu0 }
  0xdc   :  { %72 = vst [vmem:[%s152_s2 + $0x8] sm:$0xff] %v67_v6  ;;  %v73_v8 = vadd.f32 %v67_v6, %v64_v4  ;;  %v81_v9 = vmul.f32 %v67_v6, %v67_v6  ;;  %v109_v10 = vpop.f32.mrb[3].mxu0 }
  0xde   :  { %v74_v11 = vrot.slane %v73_v8, 4  ;;  %v82_v12 = vadd.f32 %v81_v9, %v80_v7 }
  0xe0   :  { %v75_v13 = vadd.f32 %v74_v11, %v73_v8  ;;  %v83_v14 = vrot.slane %v82_v12, 4 }
  0xe2   :  { %v76_v15 = vrot.slane %v75_v13, 2  ;;  %v84_v16 = vadd.f32 %v83_v14, %v82_v12 }
  0xe4   :  { %v77_v17 = vadd.f32 %v76_v15, %v75_v13  ;;  %v85_v18 = vrot.slane %v84_v16, 2 }
  0xe6   :  { %v78_v19 = vrot.slane %v77_v17, 1  ;;  %v86_v20 = vadd.f32 %v85_v18, %v84_v16 }
  0xe8   :  { %v87_v21 = vrot.slane %v86_v20, 1  ;;  %v79_v22 = vadd.f32 %v78_v19, %v77_v17 }
  0xea   :  { %v88_v23 = vadd.f32 %v87_v21, %v86_v20 }
  0xec   :  { %v90_v24 = vsel %vm89_vm3, %v79_v22, %v88_v23 }
  0xed   :  { %91 = vst [vmem:[%s153_s3] sm:$0x3] %v90_v24 }

// kernel: basic_block_forward.7
= control target key start
LH: loop header
LB: loop body
LE: loop exit
PB: predicated region body
PF: predicated region fallthrough
CT: control target
= control target key end

     0   :  { %s142_s0 = inlined_call_operand.vmem [shape: f32[16,128], index: 0, kind: input, shape index: {}]   ;;  %s143_s1 = inlined_call_operand.vmem [shape: f32[16,128], index: 1, kind: input, shape index: {}]   ;;  %s144_s2 = inlined_call_operand.vmem [shape: f32[1,128], index: 2, kind: input, shape index: {}]   ;;  %s145_s3 = inlined_call_operand.vmem [shape: f32[1,128], index: 3, kind: input, shape index: {}]   ;;  %s146_s4 = inlined_call_operand.vmem [shape: f32[1,128], index: 4, kind: input, shape index: {}]   ;;  %s147_s5 = inlined_call_operand.vmem [shape: f32[1,128], index: 5, kind: input, shape index: {}]   ;;  %s148_s6 = inlined_call_operand.vmem [shape: f32[16,128], index: 6, kind: output, shape index: {}]  }
   0x1   :  { %v23_v0 = vld [vmem:[%s142_s0] sm:$0xff]  ;;  %v24_v7 = vld [vmem:[%s142_s0 + $0x8] sm:$0xff] }
   0x2   :  { %v73_v1 = vld [vmem:[%s144_s2] ss:$0 sm:$0xff]  ;;  %v44_v8 = vld [vmem:[%s143_s1 + $0x8] sm:$0xff] }
   0x3   :  { %v74_v2 = vld [vmem:[%s145_s3] ss:$0 sm:$0xff]  ;;  %v32_v3 = vmul.f32 %v73_v1, %v23_v0  ;;  %v33_v10 = vmul.f32 %v73_v1, %v24_v7 }
   0x4   :  { %v43_v4 = vld [vmem:[%s143_s1] sm:$0xff] }
   0x5   :  { %v75_v5 = vld [vmem:[%s146_s4] ss:$0 sm:$0xff]  ;;  %v41_v9 = vadd.f32 %v74_v2, %v32_v3  ;;  %v42_v14 = vadd.f32 %v74_v2, %v33_v10 }
   0x6   :  { %v52_v6 = vmul.f32 %v75_v5, %v43_v4  ;;  %v53_v11 = vmul.f32 %v75_v5, %v44_v8  ;;  %v76_v12 = vld [vmem:[%s147_s5] ss:$0 sm:$0xff] }
   0x8   :  { %v54_v13 = vadd.f32 %v52_v6, %v41_v9  ;;  %v55_v16 = vadd.f32 %v53_v11, %v42_v14 }
   0xa   :  { %v63_v15 = vadd.f32 %v76_v12, %v54_v13  ;;  %v64_v18 = vadd.f32 %v76_v12, %v55_v16 }
   0xc   :  { %v65_v17 = vmax.f32 %v63_v15, 0.0  ;;  %v66_v19 = vmax.f32 %v64_v18, 0.0 }
   0xe   :  { %67 = vst [vmem:[%s148_s6] sm:$0xff] %v65_v17  ;;  %68 = vst [vmem:[%s148_s6 + $0x8] sm:$0xff] %v66_v19 }

</bundles_post_ra>
